<compile_context>
chip_gen: v7x
topology: tpu7x:2x2x1
jax: 0.10.0
libtpu: 0.0.40
codegen_flags: <defaults>
</compile_context>

<pallas_src>
import functools

import jax
import jax.numpy as jnp
from jax.experimental import pallas as pl
from jax.experimental.pallas import tpu as pltpu


# ---------------------------------------------------------------------------
# Kernel
# ---------------------------------------------------------------------------
def lstm_onestep_kernel(
    x_ref,      # [B, I]        inputs
    h_ref,      # [B, H]        previous hidden state
    c_ref,      # [B, H]        previous cell state
    wx_ref,     # [I, 4H]       fused gate weights (input part), bf16
    wh_ref,     # [H, 4H]       fused gate weights (hidden part), bf16
    bg_ref,     # [1, 4H]       fused gate bias, f32
    v_ref,      # [H, O_pad]    output projection (lane-padded), bf16
    bv_ref,     # [1, O_pad]    output bias (lane-padded), f32
    c_out_ref,  # [B, H]
    h_out_ref,  # [B, H]
    y_out_ref,  # [B, O_pad]
    *,
    hidden_size: int,
):
    wdt = wx_ref.dtype                      # matmul input dtype (bf16)
    x = x_ref[...].astype(wdt)
    h = h_ref[...].astype(wdt)
    c_prev = c_ref[...].astype(jnp.float32)

    # One fused, lane-dense gate matmul (two accumulated dots replace the concat),
    # single broadcast bias add.
    gates = (
        jnp.dot(x, wx_ref[...], preferred_element_type=jnp.float32)
        + jnp.dot(h, wh_ref[...], preferred_element_type=jnp.float32)
        + bg_ref[...]
    )

    H = hidden_size
    zf = gates[:, 0 * H:1 * H]
    zi = gates[:, 1 * H:2 * H]
    zc = gates[:, 2 * H:3 * H]
    zo = gates[:, 3 * H:4 * H]

    def sigmoid(z):
        # sigmoid(z) = 0.5 * (tanh(0.5 z) + 1): one EUP op per gate instead of exp+div.
        return 0.5 * jnp.tanh(0.5 * z) + 0.5

    forget_gate = sigmoid(zf)
    input_gate = sigmoid(zi)
    output_gate = sigmoid(zo)
    candidate = jnp.tanh(zc)

    c_new = forget_gate * c_prev + input_gate * candidate
    h_new = output_gate * jnp.tanh(c_new)

    # Lane-dense (padded) output projection.
    y = (
        jnp.dot(h_new.astype(wdt), v_ref[...], preferred_element_type=jnp.float32)
        + bv_ref[...]
    )

    c_out_ref[...] = c_new.astype(c_out_ref.dtype)
    h_out_ref[...] = h_new.astype(h_out_ref.dtype)
    y_out_ref[...] = y.astype(y_out_ref.dtype)


# ---------------------------------------------------------------------------
# Wrapper
# ---------------------------------------------------------------------------
@functools.partial(jax.jit, static_argnames=("hidden_size", "output_size"))
def lstm_onestep(inputs, packed, cell_state=None, hidden_state=None,
                 *, hidden_size, output_size):
    """Mirrors LSTM_OneStep.forward. Returns (cell_state, hidden_state, output)."""
    b = inputs.shape[0]
    state_dtype = jnp.float32
    if hidden_state is None:
        hidden_state = jnp.zeros((b, hidden_size), state_dtype)
    if cell_state is None:
        cell_state = jnp.zeros((b, hidden_size), state_dtype)

    o_pad = packed["v"].shape[1]
    vmem = pl.BlockSpec(memory_space=pltpu.MemorySpace.VMEM)

    out_shapes = (
        jax.ShapeDtypeStruct((b, hidden_size), cell_state.dtype),
        jax.ShapeDtypeStruct((b, hidden_size), hidden_state.dtype),
        jax.ShapeDtypeStruct((b, o_pad), jnp.float32),
    )

    kernel = functools.partial(lstm_onestep_kernel, hidden_size=hidden_size)
    c_new, h_new, y_pad = pl.pallas_call(
        kernel,
        out_shape=out_shapes,
        in_specs=[vmem] * 8,
        out_specs=(vmem, vmem, vmem),
        # In-place state update: hidden -> h_new, cell -> c_new.
        input_output_aliases={1: 1, 2: 0},
        compiler_params=pltpu.CompilerParams(
            vmem_limit_bytes=32 * 1024 * 1024,
        ),
    )(inputs, hidden_state, cell_state,
      packed["wx"], packed["wh"], packed["bg"], packed["v"], packed["bv"])

    return c_new, h_new, y_pad[:, :output_size]


# ---------------------------------------------------------------------------
# Parameter init (PyTorch-like, weights transposed: [in, out]) and packing
# ---------------------------------------------------------------------------
def init_params(key, input_size, hidden_size, output_size):
    def linear_init(k, fan_in, fan_out):
        kw, kb = jax.random.split(k)
        bound = 1.0 / jnp.sqrt(fan_in)
        w = jax.random.uniform(kw, (fan_in, fan_out), jnp.float32, -bound, bound)
        bias = jax.random.uniform(kb, (1, fan_out), jnp.float32, -bound, bound)
        return w, bias

    keys = jax.random.split(key, 5)
    comb = input_size + hidden_size
    return {
        "Wf": linear_init(keys[0], comb, hidden_size),
        "Wi": linear_init(keys[1], comb, hidden_size),
        "Wc": linear_init(keys[2], comb, hidden_size),
        "Wo": linear_init(keys[3], comb, hidden_size),
        "V": linear_init(keys[4], hidden_size, output_size),
    }


def pack_params(params, input_size, hidden_size, output_size,
                weight_dtype=jnp.bfloat16, lane=128):
    """One-time packing: fused [I+H, 4H] gate weight split along K, padded V, bf16 weights."""
    w_gates = jnp.concatenate(
        [params["Wf"][0], params["Wi"][0], params["Wc"][0], params["Wo"][0]], axis=1)
    b_gates = jnp.concatenate(
        [params["Wf"][1], params["Wi"][1], params["Wc"][1], params["Wo"][1]], axis=1)

    wx = w_gates[:input_size, :].astype(weight_dtype)          # [I, 4H]
    wh = w_gates[input_size:, :].astype(weight_dtype)          # [H, 4H]

    v, bv = params["V"]
    o_pad = max(lane, ((output_size + lane - 1) // lane) * lane)
    v_pad = jnp.zeros((hidden_size, o_pad), jnp.float32).at[:, :output_size].set(v)
    bv_pad = jnp.zeros((1, o_pad), jnp.float32).at[:, :output_size].set(bv)

    return {
        "wx": wx,
        "wh": wh,
        "bg": b_gates.astype(jnp.float32),
        "v": v_pad.astype(weight_dtype),
        "bv": bv_pad,
    }


# ---------------------------------------------------------------------------
# Pure-JAX reference (same packed/bf16 weights, zero initial states)
# ---------------------------------------------------------------------------
def lstm_onestep_ref(inputs, packed, hidden_size, output_size):
    b = inputs.shape[0]
    h = jnp.zeros((b, hidden_size), jnp.float32)
    c = jnp.zeros((b, hidden_size), jnp.float32)
    wdt = packed["wx"].dtype

    gates = (
        jnp.dot(inputs.astype(wdt), packed["wx"], preferred_element_type=jnp.float32)
        + jnp.dot(h.astype(wdt), packed["wh"], preferred_element_type=jnp.float32)
        + packed["bg"]
    )
    H = hidden_size
    f = jax.nn.sigmoid(gates[:, 0 * H:1 * H])
    i = jax.nn.sigmoid(gates[:, 1 * H:2 * H])
    g = jnp.tanh(gates[:, 2 * H:3 * H])
    o = jax.nn.sigmoid(gates[:, 3 * H:4 * H])

    c_new = f * c + i * g
    h_new = o * jnp.tanh(c_new)
    y = (
        jnp.dot(h_new.astype(wdt), packed["v"], preferred_element_type=jnp.float32)
        + packed["bv"]
    )
    return c_new, h_new, y[:, :output_size]


if __name__ == "__main__":
    input_size, hidden_size, output_size = 16, 32, 8   # 4H = 128 -> lane-dense gates
    batch = 8

    key = jax.random.PRNGKey(0)
    k_params, k_x = jax.random.split(key)
    params = init_params(k_params, input_size, hidden_size, output_size)
    packed = pack_params(params, input_size, hidden_size, output_size)
    x = jax.random.normal(k_x, (batch, input_size), jnp.float32)

    c_new, h_new, y = lstm_onestep(
        x, packed, hidden_size=hidden_size, output_size=output_size
    )
    jax.block_until_ready((c_new, h_new, y))

    c_ref, h_ref, y_ref = lstm_onestep_ref(x, packed, hidden_size, output_size)
    assert jnp.allclose(c_new, c_ref, atol=1e-3, rtol=1e-3), "cell_state mismatch"
    assert jnp.allclose(h_new, h_ref, atol=1e-3, rtol=1e-3), "hidden_state mismatch"
    assert jnp.allclose(y, y_ref, atol=1e-3, rtol=1e-3), "output mismatch"

    print("KERNEL_OK")
</pallas_src>

<mosaic_0001>
module attributes {stable_mosaic.version = 11 : i64} {
  func.func @lstm_onestep_kernel(%arg0: memref<8x16xf32, #tpu.memory_space<vmem>>, %arg1: memref<8x32xf32, #tpu.memory_space<vmem>>, %arg2: memref<8x32xf32, #tpu.memory_space<vmem>>, %arg3: memref<16x128xbf16, #tpu.memory_space<vmem>>, %arg4: memref<32x128xbf16, #tpu.memory_space<vmem>>, %arg5: memref<1x128xf32, #tpu.memory_space<vmem>>, %arg6: memref<32x128xbf16, #tpu.memory_space<vmem>>, %arg7: memref<1x128xf32, #tpu.memory_space<vmem>>, %arg8: memref<8x32xf32, #tpu.memory_space<vmem>>, %arg9: memref<8x32xf32, #tpu.memory_space<vmem>>, %arg10: memref<8x128xf32, #tpu.memory_space<vmem>>) attributes {dimension_semantics = [], scalar_prefetch = 0 : i64, scratch_operands = 0 : i64, tpu.core_type = #tpu.core_type<tc>} {
    %c0 = arith.constant 0 : index
    %c0_0 = arith.constant 0 : index
    %0 = vector.load %arg0[%c0, %c0_0] : memref<8x16xf32, #tpu.memory_space<vmem>>, vector<8x16xf32>
    %1 = arith.truncf %0 : vector<8x16xf32> to vector<8x16xbf16>
    %c0_1 = arith.constant 0 : index
    %c0_2 = arith.constant 0 : index
    %2 = vector.load %arg1[%c0_1, %c0_2] : memref<8x32xf32, #tpu.memory_space<vmem>>, vector<8x32xf32>
    %3 = arith.truncf %2 : vector<8x32xf32> to vector<8x32xbf16>
    %c0_3 = arith.constant 0 : index
    %c0_4 = arith.constant 0 : index
    %4 = vector.load %arg2[%c0_3, %c0_4] : memref<8x32xf32, #tpu.memory_space<vmem>>, vector<8x32xf32>
    %c0_5 = arith.constant 0 : index
    %c0_6 = arith.constant 0 : index
    %5 = vector.load %arg3[%c0_5, %c0_6] : memref<16x128xbf16, #tpu.memory_space<vmem>>, vector<16x128xbf16>
    %cst = arith.constant dense<0.000000e+00> : vector<8x128xf32>
    %6 = tpu.matmul %1, %5, %cst {dimension_numbers = #tpu.dot_dimension_numbers<[1], [0], [0], [1], [0, 0, 1, 1], [], []>} : vector<8x16xbf16>, vector<16x128xbf16>, vector<8x128xf32> -> vector<8x128xf32>
    %c0_7 = arith.constant 0 : index
    %c0_8 = arith.constant 0 : index
    %7 = vector.load %arg4[%c0_7, %c0_8] : memref<32x128xbf16, #tpu.memory_space<vmem>>, vector<32x128xbf16>
    %cst_9 = arith.constant dense<0.000000e+00> : vector<8x128xf32>
    %8 = tpu.matmul %3, %7, %cst_9 {dimension_numbers = #tpu.dot_dimension_numbers<[1], [0], [0], [1], [0, 0, 1, 1], [], []>} : vector<8x32xbf16>, vector<32x128xbf16>, vector<8x128xf32> -> vector<8x128xf32>
    %9 = arith.addf %6, %8 : vector<8x128xf32>
    %c0_10 = arith.constant 0 : index
    %c0_11 = arith.constant 0 : index
    %10 = vector.load %arg5[%c0_10, %c0_11] : memref<1x128xf32, #tpu.memory_space<vmem>>, vector<1x128xf32>
    %11 = vector.broadcast %10 : vector<1x128xf32> to vector<8x128xf32>
    %12 = arith.addf %9, %11 : vector<8x128xf32>
    %13 = vector.extract_strided_slice %12 {offsets = [0, 0], sizes = [8, 32], strides = [1, 1]} : vector<8x128xf32> to vector<8x32xf32>
    %14 = vector.extract_strided_slice %12 {offsets = [0, 32], sizes = [8, 32], strides = [1, 1]} : vector<8x128xf32> to vector<8x32xf32>
    %15 = vector.extract_strided_slice %12 {offsets = [0, 64], sizes = [8, 32], strides = [1, 1]} : vector<8x128xf32> to vector<8x32xf32>
    %16 = vector.extract_strided_slice %12 {offsets = [0, 96], sizes = [8, 32], strides = [1, 1]} : vector<8x128xf32> to vector<8x32xf32>
    %cst_12 = arith.constant 5.000000e-01 : f32
    %17 = vector.broadcast %cst_12 : f32 to vector<8x32xf32>
    %18 = arith.mulf %17, %13 : vector<8x32xf32>
    %19 = math.tanh %18 : vector<8x32xf32>
    %cst_13 = arith.constant 5.000000e-01 : f32
    %20 = vector.broadcast %cst_13 : f32 to vector<8x32xf32>
    %21 = arith.mulf %20, %19 : vector<8x32xf32>
    %cst_14 = arith.constant 5.000000e-01 : f32
    %22 = vector.broadcast %cst_14 : f32 to vector<8x32xf32>
    %23 = arith.addf %21, %22 : vector<8x32xf32>
    %cst_15 = arith.constant 5.000000e-01 : f32
    %24 = vector.broadcast %cst_15 : f32 to vector<8x32xf32>
    %25 = arith.mulf %24, %14 : vector<8x32xf32>
    %26 = math.tanh %25 : vector<8x32xf32>
    %cst_16 = arith.constant 5.000000e-01 : f32
    %27 = vector.broadcast %cst_16 : f32 to vector<8x32xf32>
    %28 = arith.mulf %27, %26 : vector<8x32xf32>
    %cst_17 = arith.constant 5.000000e-01 : f32
    %29 = vector.broadcast %cst_17 : f32 to vector<8x32xf32>
    %30 = arith.addf %28, %29 : vector<8x32xf32>
    %cst_18 = arith.constant 5.000000e-01 : f32
    %31 = vector.broadcast %cst_18 : f32 to vector<8x32xf32>
    %32 = arith.mulf %31, %16 : vector<8x32xf32>
    %33 = math.tanh %32 : vector<8x32xf32>
    %cst_19 = arith.constant 5.000000e-01 : f32
    %34 = vector.broadcast %cst_19 : f32 to vector<8x32xf32>
    %35 = arith.mulf %34, %33 : vector<8x32xf32>
    %cst_20 = arith.constant 5.000000e-01 : f32
    %36 = vector.broadcast %cst_20 : f32 to vector<8x32xf32>
    %37 = arith.addf %35, %36 : vector<8x32xf32>
    %38 = math.tanh %15 : vector<8x32xf32>
    %39 = arith.mulf %23, %4 : vector<8x32xf32>
    %40 = arith.mulf %30, %38 : vector<8x32xf32>
    %41 = arith.addf %39, %40 : vector<8x32xf32>
    %42 = math.tanh %41 : vector<8x32xf32>
    %43 = arith.mulf %37, %42 : vector<8x32xf32>
    %44 = arith.truncf %43 : vector<8x32xf32> to vector<8x32xbf16>
    %c0_21 = arith.constant 0 : index
    %c0_22 = arith.constant 0 : index
    %45 = vector.load %arg6[%c0_21, %c0_22] : memref<32x128xbf16, #tpu.memory_space<vmem>>, vector<32x128xbf16>
    %cst_23 = arith.constant dense<0.000000e+00> : vector<8x128xf32>
    %46 = tpu.matmul %44, %45, %cst_23 {dimension_numbers = #tpu.dot_dimension_numbers<[1], [0], [0], [1], [0, 0, 1, 1], [], []>} : vector<8x32xbf16>, vector<32x128xbf16>, vector<8x128xf32> -> vector<8x128xf32>
    %c0_24 = arith.constant 0 : index
    %c0_25 = arith.constant 0 : index
    %47 = vector.load %arg7[%c0_24, %c0_25] : memref<1x128xf32, #tpu.memory_space<vmem>>, vector<1x128xf32>
    %48 = vector.broadcast %47 : vector<1x128xf32> to vector<8x128xf32>
    %49 = arith.addf %46, %48 : vector<8x128xf32>
    %c0_26 = arith.constant 0 : index
    %c0_27 = arith.constant 0 : index
    %50 = vector.load %arg8[%c0_26, %c0_27] : memref<8x32xf32, #tpu.memory_space<vmem>>, vector<8x32xf32>
    tpu.vector_store %arg8[%c0_26, %c0_27], %41 {strides = array<i32>} : memref<8x32xf32, #tpu.memory_space<vmem>>, vector<8x32xf32>,
    %c0_28 = arith.constant 0 : index
    %c0_29 = arith.constant 0 : index
    %51 = vector.load %arg9[%c0_28, %c0_29] : memref<8x32xf32, #tpu.memory_space<vmem>>, vector<8x32xf32>
    tpu.vector_store %arg9[%c0_28, %c0_29], %43 {strides = array<i32>} : memref<8x32xf32, #tpu.memory_space<vmem>>, vector<8x32xf32>,
    %c0_30 = arith.constant 0 : index
    %c0_31 = arith.constant 0 : index
    %52 = vector.load %arg10[%c0_30, %c0_31] : memref<8x128xf32, #tpu.memory_space<vmem>>, vector<8x128xf32>
    tpu.vector_store %arg10[%c0_30, %c0_31], %49 {strides = array<i32>} : memref<8x128xf32, #tpu.memory_space<vmem>>, vector<8x128xf32>,
    return
  }
}

</mosaic_0001>

<bundles_post_ra>
// kernel: lstm_onestep.1
= control target key start
LH: loop header
LB: loop body
LE: loop exit
PB: predicated region body
PF: predicated region fallthrough
CT: control target
= control target key end

     0   :  { %16 = vsyncpa [#allocation3], 0  ;;  %s621_s0 = inlined_call_operand.hbm [shape: f32[8,16], index: 0, kind: input, shape index: {}]   ;;  %s622_s1 = inlined_call_operand.vmem [shape: f32[8,32], index: 1, kind: input, shape index: {}, may-alias: {1,9}]   ;;  %s623_s2 = inlined_call_operand.vmem [shape: f32[8,32], index: 2, kind: input, shape index: {}, may-alias: {2,8}]   ;;  %s624_s3 = inlined_call_operand.hbm [shape: bf16[16,128], index: 3, kind: input, shape index: {}]   ;;  %s625_s4 = inlined_call_operand.vmem [shape: bf16[32,128], index: 4, kind: input, shape index: {}]   ;;  %s626_s5 = inlined_call_operand.vmem [shape: f32[1,128], index: 5, kind: input, shape index: {}]   ;;  %s627_s6 = inlined_call_operand.vmem [shape: bf16[32,128], index: 6, kind: input, shape index: {}]   ;;  %s628_s7 = inlined_call_operand.hbm [shape: f32[1,128], index: 7, kind: input, shape index: {}]   ;;  %s629_s8 = inlined_call_operand.vmem [shape: f32[8,32], index: 8, kind: output, shape index: {0}, may-alias: {2,8}]   ;;  %s630_s9 = inlined_call_operand.vmem [shape: f32[8,32], index: 9, kind: output, shape index: {1}, may-alias: {1,9}]   ;;  %s631_s10 = inlined_call_operand.hbm [shape: f32[8,128], index: 10, kind: output, shape index: {2}]  }
   0x1   :  { %17 = vsyncpa [#allocation6], 0 }
   0x2   :  { %18 = vsyncpa [#allocation4], 0  ;;  %s474_s13 = smov [#allocation5]   ;;  %s380_s17 = scalar_lea.hbm %s624_s3, 128 }
   0x3   :  { %s38_s14 = sshll.u32 %s474_s13, 4  ;;  %p381_p0 = scmp.ne.s32.totalorder %s624_s3, %s380_s17  ;;  %s39_s14 = int_to_ptr.vmem [resolvable:$true] %s38_s14 }
   0x4   :  { %p384_p1 = scmp.lt.u32.totalorder %s380_s17, %s624_s3 }
   0x6   :  { %p386_p2 = pnand %p384_p1, %p381_p0 }
   0x8   :  { %389 = shalt.err (!%p386_p2)
}
   0x9   :  { %s390_s22 = scalar_lea.vmem %s39_s14, 128  ;;  %p395_p4 = scmp.lt.s32.totalorder %s39_s14, %s39_s14 }
   0xa   :  { %p391_p3 = scmp.ne.s32.totalorder %s39_s14, %s390_s22  ;;  %p396_p5 = scmp.lt.s32.totalorder %s390_s22, %s390_s22 }
   0xc   :  { %p397_p6 = por %p396_p5, %p395_p4 }
   0xe   :  { %p398_p7 = pnand %p397_p6, %p391_p3 }
  0x10   :  { %401 = shalt.err (!%p398_p7)
}
  0x11   :  { %s475_s23 = smov 64   ;;  %s476_s24 = smov 4  }
  0x12   :  { %44 = dma.hbm_to_vmem [thread:$0]  %s624_s3, 128, %s39_s14, [#allocation6], %s475_s23, %s475_s23, %s476_s24  }
  0x13   :  { %s477_s27 = smov [#allocation2]   ;;  %s478_s29 = smov [#allocation7]  }
  0x14   :  { %s25_s28 = sshll.u32 %s477_s27, 4  ;;  %s57_s30 = sshll.u32 %s478_s29, 4  ;;  %s26_s28 = int_to_ptr.vmem [resolvable:$true] %s25_s28  ;;  %s58_s30 = int_to_ptr.vmem [resolvable:$true] %s57_s30 }
  0x15   :  { %s402_s13 = scalar_lea.hbm %s621_s0, 128 }
  0x16   :  { %p403_p8 = scmp.ne.s32.totalorder %s621_s0, %s402_s13  ;;  %p406_p9 = scmp.lt.u32.totalorder %s402_s13, %s621_s0 }
  0x18   :  { %p408_p10 = pnand %p406_p9, %p403_p8 }
  0x1a   :  { %411 = shalt.err (!%p408_p10)
}
  0x1b   :  { %s412_s3 = scalar_lea.vmem %s26_s28, 128  ;;  %p417_p12 = scmp.lt.s32.totalorder %s26_s28, %s26_s28 }
  0x1c   :  { %p413_p11 = scmp.ne.s32.totalorder %s26_s28, %s412_s3  ;;  %p418_p13 = scmp.lt.s32.totalorder %s412_s3, %s412_s3 }
  0x1e   :  { %p419_p0 = por %p418_p13, %p417_p12 }
  0x20   :  { %p420_p1 = pnand %p419_p0, %p413_p11 }
  0x22   :  { %423 = shalt.err (!%p420_p1)
}
  0x23   :  { %28 = dma.hbm_to_vmem [thread:$0]  %s621_s0, 128, %s26_s28, [#allocation3]  }
  0x24   :  { %s424_s22 = scalar_lea.hbm %s628_s7, 16 }
  0x25   :  { %p425_p2 = scmp.ne.s32.totalorder %s628_s7, %s424_s22  ;;  %p428_p3 = scmp.lt.u32.totalorder %s424_s22, %s628_s7 }
  0x27   :  { %p430_p4 = pnand %p428_p3, %p425_p2 }
  0x29   :  { %433 = shalt.err (!%p430_p4)
}
  0x2a   :  { %s434_s27 = scalar_lea.vmem %s58_s30, 16  ;;  %s438_s29 = scalar_lea.vmem %s58_s30, 32 }
  0x2b   :  { %p435_p5 = scmp.ne.s32.totalorder %s58_s30, %s434_s27  ;;  %p439_p6 = scmp.lt.s32.totalorder %s58_s30, %s58_s30 }
  0x2c   :  { %p440_p7 = scmp.lt.s32.totalorder %s438_s29, %s434_s27 }
  0x2e   :  { %p441_p8 = por %p440_p7, %p439_p6 }
  0x30   :  { %p442_p9 = pnand %p441_p8, %p435_p5 }
  0x32   :  { %445 = shalt.err (!%p442_p9)
}
  0x33   :  { %60 = dma.hbm_to_vmem [thread:$0]  %s628_s7, 16, %s58_s30, [#allocation6]  }
  0x34   :  { %468 = dma.done.wait [#allocation3], 128  }
  0x35   :  { %469 = vsyncadd [#allocation3], 4294967168 }
  0x36   :  { %470 = dma.done.wait [#allocation6], 144  }
  0x37   :  { %471 = vsyncadd [#allocation6], 4294967152  ;;  %v479_v0 = vmov 0.0   ;;  %vm480_vm0 = vmmov 0   ;;  %v369_v1 = vld [vmem:[%s625_s4] sm:$0xff]   ;;  %v370_v2 = vld [vmem:[#allocation5] sm:$0xff]  }
  0x38   :  { %337 = vmatprep.subr.bf16.mxu0 %v479_v0  ;;  %345 = vmatprep.subr.bf16.mxu1 %v479_v0  ;;  %v371_v3 = vld [vmem:[%s625_s4 + $0x8] sm:$0xff]   ;;  %v71_v4 = vld [vmem:[#allocation2] sm:$0xff]  ;;  %vm144_vm1 = vcmask 130048   ;;  %vm94_vm2 = vcmask 261120   ;;  %v325_v38 = vld [vmem:[#allocation7] ss:$0 sm:$0xff] }
  0x39   :  { %347 = vmatprep.mubr.msk.bf16.mxu1 %vm480_vm0, %v479_v0  ;;  %341 = vmatprep.mubr.msk.bf16.mxu0 %vm480_vm0, %v479_v0  ;;  %v73_v5 = vld [vmem:[%s622_s1] sm:$0xff]  ;;  %v72_v6 = vpack.c.bf16 %v71_v4, %v71_v4  ;;  %s481_s1 = smov 96   ;;  %v373_v31 = vld [vmem:[%s627_s6 + $0x8] sm:$0xff]  }
  0x3a   :  { %338 = vmatpush3.bf16.msra.mxu0 %v369_v1  ;;  %346 = vmatpush3.bf16.msra.mxu1 %v370_v2  ;;  %v74_v7 = vpack.c.bf16 %v73_v5, %v73_v5  ;;  %v324_v12 = vld [vmem:[%s626_s5] ss:$0 sm:$0xff] }
  0x3b   :  { %339 = vmatprep.subr.bf16.mxu0 %v479_v0  ;;  %351 = vmatprep.subr.bf16.mxu1 %v479_v0  ;;  %v75_v26 = vld [vmem:[%s623_s2] sm:$0xff]  ;;  %s482_s2 = smov 32  }
  0x3c   :  { %v372_v30 = vld [vmem:[%s627_s6] sm:$0xff]   ;;  %s483_s6 = smov [#allocation8]  }
  0x3d   :  { %348 = vmatmul.mubr.msk.bf16.vlgmr.msra.gmra.mrb[0].mxu1 %vm144_vm1, %v72_v6  ;;  %s305_s23 = sshll.u32 %s483_s6, 4  ;;  %s306_s23 = int_to_ptr.vmem [resolvable:$true] %s305_s23 }
  0x3e   :  { %340 = vmatpush3.bf16.msra.mxu0 %v371_v3  ;;  %355 = vmatprep.mubr.msk.bf16.mxu1 %vm480_vm0, %v479_v0  ;;  %s446_s24 = scalar_lea.vmem %s306_s23, 128  ;;  %p451_p11 = scmp.lt.s32.totalorder %s306_s23, %s306_s23 }
  0x3f   :  { %352 = vmatpush3.bf16.msra.mxu1 %v372_v30  ;;  %p447_p10 = scmp.ne.s32.totalorder %s306_s23, %s446_s24  ;;  %p452_p12 = scmp.lt.s32.totalorder %s446_s24, %s446_s24 }
  0x40   :  { %353 = vmatprep.subr.bf16.mxu1 %v479_v0 }
  0x41   :  { %342 = vmatmul.mubr.msk.bf16.vlgmr.msra.gmra.mrb[0].mxu0 %vm94_vm2, %v74_v7  ;;  %p453_p13 = por %p452_p12, %p451_p11 }
  0x43   :  { %354 = vmatpush3.bf16.msra.mxu1 %v373_v31  ;;  %p454_p0 = pnand %p453_p13, %p447_p10 }
 0x110   :  { %v182_v8 = vpop.f32.mrb[0].mxu1 }
 0x111   :  { %v349_v9 = vpop.f32.mrb[1].mxu1 }
 0x112   :  { %v185_v10 = vpop.f32.mrb[2].mxu1 }
 0x113   :  { %v350_v13 = vpop.f32.mrb[3].mxu1 }
 0x114   :  { %v132_v11 = vpop.f32.mrb[0].mxu0 }
 0x115   :  { %v183_v14 = vadd.f32 %v182_v8, %v132_v11  ;;  %v343_v15 = vpop.f32.mrb[1].mxu0 }
 0x116   :  { %v135_v16 = vpop.f32.mrb[2].mxu0 }
 0x117   :  { %v195_v17 = vadd.f32 %v324_v12, %v183_v14  ;;  %v344_v18 = vpop.f32.mrb[3].mxu0 }
 0x119   :  { %374 = vtanh.f32 %v195_v17  ;;  %v196_v20 = vmul.f32 0.5, %v195_v17 }
 0x11b   :  { %376 = vtanh.f32 %v196_v20 }
 0x123   :  { %v375_v19 = vpop.eup %374 }
 0x124   :  { %203 = vrot.lane.b32.xlu0 %v375_v19, %s481_s1 }
 0x125   :  { %v377_v21 = vpop.eup %376 }
 0x126   :  { %v198_v22 = vmul.f32 0.5, %v377_v21 }
 0x128   :  { %v199_v23 = vadd.f32 0.5, %v198_v22 }
 0x12a   :  { %v201_v27 = vmul.f32 %v199_v23, %v75_v26 }
 0x196   :  { %v204_v24 = vpop.permute.xlu0 %203 }
 0x197   :  { %v206_v25 = vmul.f32 %v204_v24, %v199_v23 }
 0x199   :  { %208 = vrot.lane.b32.xlu0 %v206_v25, %s481_s1 }
 0x20b   :  { %v209_v28 = vpop.permute.xlu0 %208 }
 0x20c   :  { %v211_v29 = vadd.f32 %v209_v28, %v201_v27 }
 0x20e   :  { %378 = vtanh.f32 %v211_v29  ;;  %288 = vst.msk [vmem:[%s629_s8] sm:$0xff] %vm94_vm2, %v211_v29 }
 0x218   :  { %v379_v32 = vpop.eup %378 }
 0x219   :  { %214 = vrot.lane.b32.xlu1 %v379_v32, %s481_s1 }
 0x28b   :  { %v215_v33 = vpop.permute.xlu1 %214 }
 0x28c   :  { %v217_v34 = vmul.f32 %v215_v33, %v199_v23 }
 0x28e   :  { %v218_v35 = vpack.c.bf16 %v217_v34, %v217_v34  ;;  %290 = vrot.lane.b32.xlu0 %v217_v34, %s482_s2 }
 0x290   :  { %231 = vrot.lane.b32.xlu1 %v218_v35, %s482_s2 }
 0x300   :  { %v291_v36 = vpop.permute.xlu0 %290 }
 0x301   :  { %293 = vst.msk [vmem:[%s630_s9] sm:$0xff] %vm94_vm2, %v291_v36 }
 0x302   :  { %v232_v37 = vpop.permute.xlu1 %231 }
 0x303   :  { %356 = vmatmul.mubr.msk.bf16.vlgmr.msra.gmra.mrb[4].mxu1 %vm94_vm2, %v232_v37 }
 0x3d6   :  { %v282_v39 = vpop.f32.mrb[4].mxu1 }
 0x3d7   :  { %v283_v40 = vadd.f32 %v325_v38, %v282_v39  ;;  %v357_v41 = vpop.f32.mrb[5].mxu1 }
 0x3d8   :  { %v285_v42 = vpop.f32.mrb[6].mxu1 }
 0x3d9   :  { %294 = vst [vmem:[#allocation8] sm:$0xff] %v283_v40  ;;  %v358_v43 = vpop.f32.mrb[7].mxu1 }
 0x3da   :  { %457 = shalt.err (!%p454_p0)
}
 0x3db   :  { %s458_s26 = scalar_lea.hbm %s631_s10, 128 }
 0x3dc   :  { %p459_p1 = scmp.ne.s32.totalorder %s631_s10, %s458_s26  ;;  %p462_p2 = scmp.lt.u32.totalorder %s458_s26, %s631_s10 }
 0x3de   :  { %p464_p3 = pnand %p462_p2, %p459_p1 }
 0x3e0   :  { %467 = shalt.err (!%p464_p3)
}
 0x3e1   :  { %308 = dma.vmem_to_hbm [thread:$0]  %s306_s23, 128, %s631_s10, [#allocation4]  }
 0x3e2   :  { %472 = dma.done.wait [#allocation4], 128  }
 0x3e3   :  { %473 = vsyncadd [#allocation4], 4294967168 }
 0x3e4   :  { %316 = vsyncpa [#allocation3], 1 }
 0x3e5   :  { %317 = vsyncpa [#allocation6], 1 }
 0x3e6   :  { %318 = vsyncpa [#allocation4], 1 }

</bundles_post_ra>
